<compile_context>
chip_gen: v5e
topology: v5e:2x2
jax: 0.10.0
libtpu: 0.0.40
codegen_flags: <defaults>
</compile_context>

<pallas_src>
import functools
import math

import jax
import jax.numpy as jnp
from jax.experimental import pallas as pl
from jax.experimental.pallas import tpu as pltpu


VMEM_LIMIT = 48 * 1024 * 1024  # raised scoped-VMEM budget (safe on v5e/v6e/v7x)


def _cparams(*sem):
    return pltpu.CompilerParams(dimension_semantics=sem,
                                vmem_limit_bytes=VMEM_LIMIT)


# --------------------------------------------------------------------------
# Tiling helpers
# --------------------------------------------------------------------------

def _row_tile(M, cap=512):
    # full extent when small (always legal), else an 8-divisible cap
    return M if M <= cap else cap


def _col_tile(N, cap=512):
    # full extent when small (always legal), else a 128-divisible cap
    return N if N <= cap else cap


# --------------------------------------------------------------------------
# Pallas kernels
# --------------------------------------------------------------------------

def _linear_kernel(x_ref, w_ref, b_ref, o_ref):
    # x: (tm, K), w: (K, tn) bf16, b: (1, tn) f32 -> o: (tm, tn)
    x = x_ref[...].astype(jnp.bfloat16)
    w = w_ref[...].astype(jnp.bfloat16)
    o_ref[...] = (jnp.dot(x, w, preferred_element_type=jnp.float32)
                  + b_ref[...]).astype(o_ref.dtype)


def linear(x, w, b, out_dtype=jnp.bfloat16):
    """y = x @ w + b.

    Grid is (N-tiles, M-tiles) with M innermost so every (K, tn) weight tile
    stays VMEM-resident across the inner m loop and is read from HBM exactly
    once (matters for the vocab projection where the weight dominates)."""
    M, K = x.shape
    N = w.shape[1]
    tm = _row_tile(M)
    tn = _col_tile(N)
    grid = (pl.cdiv(N, tn), pl.cdiv(M, tm))
    return pl.pallas_call(
        _linear_kernel,
        out_shape=jax.ShapeDtypeStruct((M, N), out_dtype),
        grid_spec=pltpu.PrefetchScalarGridSpec(
            num_scalar_prefetch=0,
            grid=grid,
            in_specs=[
                pl.BlockSpec((tm, K), lambda n, m: (m, 0)),
                pl.BlockSpec((K, tn), lambda n, m: (0, n)),   # resident over m
                pl.BlockSpec((1, tn), lambda n, m: (0, n)),
            ],
            out_specs=pl.BlockSpec((tm, tn), lambda n, m: (m, n)),
        ),
        compiler_params=_cparams("parallel", "parallel"),
    )(x, w, b.reshape(1, N))


def _add_layernorm_kernel(x_ref, r_ref, g_ref, b_ref, o_ref):
    # fused residual + LayerNorm: LN(x + r), f32 statistics, bf16 I/O
    x = x_ref[...].astype(jnp.float32) + r_ref[...].astype(jnp.float32)
    mean = jnp.mean(x, axis=-1, keepdims=True)
    var = jnp.mean((x - mean) ** 2, axis=-1, keepdims=True)
    y = (x - mean) * jax.lax.rsqrt(var + 1e-5)
    o_ref[...] = (y * g_ref[...] + b_ref[...]).astype(o_ref.dtype)


def add_layer_norm(x, r, g, b, out_dtype=jnp.bfloat16):
    M, D = x.shape
    tm = _row_tile(M)
    return pl.pallas_call(
        _add_layernorm_kernel,
        out_shape=jax.ShapeDtypeStruct((M, D), out_dtype),
        grid_spec=pltpu.PrefetchScalarGridSpec(
            num_scalar_prefetch=0,
            grid=(pl.cdiv(M, tm),),
            in_specs=[
                pl.BlockSpec((tm, D), lambda m: (m, 0)),
                pl.BlockSpec((tm, D), lambda m: (m, 0)),
                pl.BlockSpec((1, D), lambda m: (0, 0)),
                pl.BlockSpec((1, D), lambda m: (0, 0)),
            ],
            out_specs=pl.BlockSpec((tm, D), lambda m: (m, 0)),
        ),
        compiler_params=_cparams("parallel"),
    )(x, r, g.reshape(1, D), b.reshape(1, D))


def _ffn_kernel(x_ref, w1_ref, b1_ref, w2_ref, b2_ref, o_ref):
    x = x_ref[...].astype(jnp.bfloat16)
    h = (jnp.dot(x, w1_ref[...].astype(jnp.bfloat16),
                 preferred_element_type=jnp.float32) + b1_ref[...])
    h = jnp.maximum(h, 0.0)                                    # ReLU in f32
    o_ref[...] = (
        jnp.dot(h.astype(jnp.bfloat16), w2_ref[...].astype(jnp.bfloat16),
                preferred_element_type=jnp.float32) + b2_ref[...]
    ).astype(o_ref.dtype)


def ffn(x, w1, b1, w2, b2, out_dtype=jnp.bfloat16):
    # TODO(synk): at production D/Dff add a K-tiled (Dff) accumulation axis so
    # both weight slabs need not be VMEM-resident at once (v5e 16 MiB default).
    M, D = x.shape
    Dff = w1.shape[1]
    tm = _row_tile(M)
    return pl.pallas_call(
        _ffn_kernel,
        out_shape=jax.ShapeDtypeStruct((M, D), out_dtype),
        grid_spec=pltpu.PrefetchScalarGridSpec(
            num_scalar_prefetch=0,
            grid=(pl.cdiv(M, tm),),
            in_specs=[
                pl.BlockSpec((tm, D), lambda m: (m, 0)),
                pl.BlockSpec((D, Dff), lambda m: (0, 0)),
                pl.BlockSpec((1, Dff), lambda m: (0, 0)),
                pl.BlockSpec((Dff, D), lambda m: (0, 0)),
                pl.BlockSpec((1, D), lambda m: (0, 0)),
            ],
            out_specs=pl.BlockSpec((tm, D), lambda m: (m, 0)),
        ),
        compiler_params=_cparams("parallel"),
    )(x, w1, b1.reshape(1, Dff), w2, b2.reshape(1, D))


def _attention_kernel(q_src_ref, kv_src_ref, mask_ref, wo_ref, bo_ref, o_ref,
                      *, num_heads, head_dim, q_off, k_off, v_off):
    # q_src:  (1, tq, Cq)  bf16 slab holding the q columns (softmax scale
    #         already folded into the q projection weights)
    # kv_src: (1, Sk, Ckv) bf16 slab holding k/v columns (VMEM-resident across
    #         the inner q-tile grid axis)
    # mask:   (1, 1|tq, Sk) additive f32
    # wo:     (H, Dh, D) bf16, bo: (1, D) f32  (fused output projection)
    H, Dh = num_heads, head_dim
    q_slab = q_src_ref[0]        # (tq, Cq)
    kv_slab = kv_src_ref[0]      # (Sk, Ckv)

    def heads(slab, off):        # head-major (H, rows, Dh): one relayout,
        return jnp.stack(        # everything below is head-batched
            [slab[:, off + h * Dh: off + (h + 1) * Dh] for h in range(H)],
            axis=0)

    qh = heads(q_slab, q_off).astype(jnp.bfloat16)    # (H, tq, Dh)
    kh = heads(kv_slab, k_off).astype(jnp.bfloat16)   # (H, Sk, Dh)
    vh = heads(kv_slab, v_off).astype(jnp.bfloat16)   # (H, Sk, Dh)

    # one batched QK^T over all heads (single MXU stream, no per-head loop)
    s = jax.lax.dot_general(qh, kh, (((2,), (2,)), ((0,), (0,))),
                            preferred_element_type=jnp.float32)   # (H, tq, Sk)
    s = s + mask_ref[0][None].astype(jnp.float32)     # broadcast over heads
    m = jnp.max(s, axis=-1, keepdims=True)
    p = jnp.exp(s - m)
    p = p * pl.reciprocal(jnp.sum(p, axis=-1, keepdims=True), approx=True)

    o = jax.lax.dot_general(p.astype(jnp.bfloat16), vh,
                            (((2,), (1,)), ((0,), (0,))),
                            preferred_element_type=jnp.float32)   # (H, tq, Dh)

    # fused output projection: per-head (Dh, D) weight blocks, batched matmul
    # and a sum over heads -> no trailing concat, one lane-dense store over D
    proj = jax.lax.dot_general(o.astype(jnp.bfloat16), wo_ref[...],
                               (((2,), (1,)), ((0,), (0,))),
                               preferred_element_type=jnp.float32)  # (H, tq, D)
    proj = jnp.sum(proj, axis=0) + bo_ref[...]
    o_ref[0] = proj.astype(o_ref.dtype)


def attention(q_src, kv_src, mask, wo, bo, *, num_heads, head_dim,
              q_off, k_off, v_off, out_dtype=jnp.bfloat16, tq_cap=256):
    """Multi-head attention with the output projection fused in.

    q_src:  (B, Sq, Cq)  fused projection slab containing q at column q_off
    kv_src: (B, Sk, Ckv) fused projection slab containing k/v at k_off/v_off
    mask:   (Bm, Sm, Sk) additive f32, Bm in {1, B}, Sm in {1, Sq}
    """
    B, Sq, Cq = q_src.shape
    _, Sk, Ckv = kv_src.shape
    Bm, Sm, _ = mask.shape
    D = num_heads * head_dim
    tq = Sq if Sq <= tq_cap else tq_cap   # q-tiling bounds VMEM (v7x: 64 MiB)
    # TODO(synk): add Sk tiling with an online-softmax accumulator for very
    # long contexts (flash style); unnecessary at these sizes.
    grid = (B, pl.cdiv(Sq, tq))

    def bsel(b):
        return b if Bm == B else 0

    if Sm == 1:
        mask_block = (1, 1, Sk)
        mask_map = lambda b, qi: (bsel(b), 0, 0)
    else:
        mask_block = (1, tq, Sk)
        mask_map = lambda b, qi: (bsel(b), qi, 0)

    kern = functools.partial(_attention_kernel, num_heads=num_heads,
                             head_dim=head_dim, q_off=q_off, k_off=k_off,
                             v_off=v_off)
    return pl.pallas_call(
        kern,
        out_shape=jax.ShapeDtypeStruct((B, Sq, D), out_dtype),
        grid_spec=pltpu.PrefetchScalarGridSpec(
            num_scalar_prefetch=0,
            grid=grid,
            in_specs=[
                pl.BlockSpec((1, tq, Cq), lambda b, qi: (b, qi, 0)),
                pl.BlockSpec((1, Sk, Ckv), lambda b, qi: (b, 0, 0)),  # resident
                pl.BlockSpec(mask_block, mask_map),
                pl.BlockSpec((num_heads, head_dim, D), lambda b, qi: (0, 0, 0)),
                pl.BlockSpec((1, D), lambda b, qi: (0, 0)),
            ],
            out_specs=pl.BlockSpec((1, tq, D), lambda b, qi: (b, qi, 0)),
        ),
        compiler_params=_cparams("parallel", "parallel"),
    )(q_src, kv_src, mask, wo.reshape(num_heads, head_dim, D),
      bo.reshape(1, D))


# --------------------------------------------------------------------------
# Model glue (plain JAX: embedding gather, positional encoding, mask build)
# --------------------------------------------------------------------------

def sinusoidal_pos(S, D):
    pos = jnp.arange(S, dtype=jnp.float32)[:, None]
    i = jnp.arange(D // 2, dtype=jnp.float32)[None, :]
    angles = pos / jnp.power(10000.0, 2.0 * i / D)
    return jnp.concatenate([jnp.sin(angles), jnp.cos(angles)], axis=-1)  # (S, D)


def self_attention_block(x, p, mask, B, S, H, Dh):
    # fused QKV projection: one (D, 3D) matmul over the shared activation slab;
    # q/k/v are index-sliced out of the slab inside the attention kernel and
    # the output projection is fused into the same kernel.
    D = H * Dh
    qkv = linear(x, p["w_qkv"], p["b_qkv"]).reshape(B, S, 3 * D)  # free reshape
    return attention(qkv, qkv, mask, p["wo"], p["bo"],
                     num_heads=H, head_dim=Dh, q_off=0, k_off=D, v_off=2 * D)


def cross_attention_block(x_q, enc_kv, p, mask, B, Sq, H, Dh):
    # Q from the decoder stream, fused KV slab precomputed from encoder output
    D = H * Dh
    q = linear(x_q, p["wq"], p["bq"]).reshape(B, Sq, D)
    return attention(q, enc_kv, mask, p["wo"], p["bo"],
                     num_heads=H, head_dim=Dh, q_off=0, k_off=0, v_off=D)


def encoder_forward(enc, src_tokens, src_lengths, num_heads):
    B, S = src_tokens.shape
    D = enc["embed"].shape[1]
    Dh = D // num_heads
    x = enc["embed"][src_tokens] * math.sqrt(D) + sinusoidal_pos(S, D)
    x = x.reshape(B * S, D).astype(jnp.bfloat16)        # bf16 residual stream

    key_pad = jnp.arange(S)[None, :] >= src_lengths[:, None]              # (B, S)
    mask = jnp.where(key_pad[:, None, :], -1e9, 0.0).astype(jnp.float32)  # (B,1,S)

    a = self_attention_block(x, enc["self_attn"], mask, B, S, num_heads, Dh)
    x = add_layer_norm(x, a.reshape(B * S, D), enc["ln1_g"], enc["ln1_b"])
    f = ffn(x, enc["ffn_w1"], enc["ffn_b1"], enc["ffn_w2"], enc["ffn_b2"])
    x = add_layer_norm(x, f, enc["ln2_g"], enc["ln2_b"])
    return {"encoder_out": x.reshape(B, S, D), "encoder_padding_mask": key_pad}


def decoder_forward(dec, prev_output_tokens, encoder_out, num_heads):
    B, T = prev_output_tokens.shape
    D = dec["embed"].shape[1]
    Dh = D // num_heads
    enc_x = encoder_out["encoder_out"]                 # (B, S, D) bf16
    enc_pad = encoder_out["encoder_padding_mask"]      # (B, S) bool
    S = enc_x.shape[1]

    x = dec["embed"][prev_output_tokens] * math.sqrt(D) + sinusoidal_pos(T, D)
    x = x.reshape(B * T, D).astype(jnp.bfloat16)

    # causal self-attention (mask kept un-replicated: (1, T, T))
    causal = jnp.arange(T)[None, :] > jnp.arange(T)[:, None]
    self_mask = jnp.where(causal, -1e9, 0.0).astype(jnp.float32)[None]
    a = self_attention_block(x, dec["self_attn"], self_mask, B, T, num_heads, Dh)
    x = add_layer_norm(x, a.reshape(B * T, D), dec["ln1_g"], dec["ln1_b"])

    # cross-attention: fused KV slab from encoder output, padding mask (B,1,S)
    ca = dec["cross_attn"]
    enc_kv = linear(enc_x.reshape(B * S, D), ca["w_kv"],
                    ca["b_kv"]).reshape(B, S, 2 * D)
    cross_mask = jnp.where(enc_pad[:, None, :], -1e9, 0.0).astype(jnp.float32)
    c = cross_attention_block(x, enc_kv, ca, cross_mask, B, T, num_heads, Dh)
    x = add_layer_norm(x, c.reshape(B * T, D), dec["ln2_g"], dec["ln2_b"])

    f = ffn(x, dec["ffn_w1"], dec["ffn_b1"], dec["ffn_w2"], dec["ffn_b2"])
    x = add_layer_norm(x, f, dec["ln3_g"], dec["ln3_b"])

    # vocab projection: weight-resident (N-outer, M-inner) tiled GEMM, f32 out
    logits = linear(x, dec["out_w"], dec["out_b"],
                    out_dtype=jnp.float32).reshape(B, T, -1)
    return logits, {"attn": None, "encoder_out": encoder_out}


class EncoderDecoderModel:
    """JAX/Pallas analog of the PyTorch EncoderDecoderModel base class."""

    def __init__(self, encoder_params, decoder_params, num_heads):
        self.encoder = encoder_params
        self.decoder = decoder_params
        self.num_heads = num_heads

    def forward(self, src_tokens, src_lengths, prev_output_tokens, **kwargs):
        encoder_out = encoder_forward(self.encoder, src_tokens, src_lengths,
                                      self.num_heads)
        decoder_out = decoder_forward(self.decoder, prev_output_tokens,
                                      encoder_out, self.num_heads)
        return decoder_out  # (logits (B, tgt_len, vocab), extras dict)

    def get_normalized_probs(self, net_output, log_probs):
        logits = net_output[0].astype(jnp.float32)
        return (jax.nn.log_softmax(logits, axis=-1) if log_probs
                else jax.nn.softmax(logits, axis=-1))


# --------------------------------------------------------------------------
# Deterministic parameter initialization (matmul weights stored in bf16)
# --------------------------------------------------------------------------

def _dense_f32(key, fan_in, fan_out):
    return jax.random.normal(key, (fan_in, fan_out), jnp.float32) * 0.02


def _dense(key, fan_in, fan_out, dtype=jnp.bfloat16):
    return _dense_f32(key, fan_in, fan_out).astype(dtype)


def _attn_self_params(key, d, num_heads):
    k1, k2 = jax.random.split(key)
    scale = 1.0 / math.sqrt(d // num_heads)
    w_qkv = _dense_f32(k1, d, 3 * d)
    w_qkv = w_qkv.at[:, :d].multiply(scale)   # fold softmax scale into q proj
    return {"w_qkv": w_qkv.astype(jnp.bfloat16),
            "b_qkv": jnp.zeros((3 * d,), jnp.float32),
            "wo": _dense(k2, d, d), "bo": jnp.zeros((d,), jnp.float32)}


def _attn_cross_params(key, d, num_heads):
    k1, k2, k3 = jax.random.split(key, 3)
    scale = 1.0 / math.sqrt(d // num_heads)
    wq = (_dense_f32(k1, d, d) * scale).astype(jnp.bfloat16)  # scale folded
    return {"wq": wq, "bq": jnp.zeros((d,), jnp.float32),
            "w_kv": _dense(k2, d, 2 * d),
            "b_kv": jnp.zeros((2 * d,), jnp.float32),
            "wo": _dense(k3, d, d), "bo": jnp.zeros((d,), jnp.float32)}


def init_params(key, vocab_src, vocab_tgt, d_model, d_ff, num_heads):
    ks = iter(jax.random.split(key, 16))
    ones = jnp.ones((d_model,), jnp.float32)
    zeros = jnp.zeros((d_model,), jnp.float32)
    enc = {
        "embed": _dense(next(ks), vocab_src, d_model, jnp.float32),
        "self_attn": _attn_self_params(next(ks), d_model, num_heads),
        "ln1_g": ones, "ln1_b": zeros,
        "ffn_w1": _dense(next(ks), d_model, d_ff),
        "ffn_b1": jnp.zeros((d_ff,), jnp.float32),
        "ffn_w2": _dense(next(ks), d_ff, d_model),
        "ffn_b2": zeros,
        "ln2_g": ones, "ln2_b": zeros,
    }
    dec = {
        "embed": _dense(next(ks), vocab_tgt, d_model, jnp.float32),
        "self_attn": _attn_self_params(next(ks), d_model, num_heads),
        "ln1_g": ones, "ln1_b": zeros,
        "cross_attn": _attn_cross_params(next(ks), d_model, num_heads),
        "ln2_g": ones, "ln2_b": zeros,
        "ffn_w1": _dense(next(ks), d_model, d_ff),
        "ffn_b1": jnp.zeros((d_ff,), jnp.float32),
        "ffn_w2": _dense(next(ks), d_ff, d_model),
        "ffn_b2": zeros,
        "ln3_g": ones, "ln3_b": zeros,
        "out_w": _dense(next(ks), d_model, vocab_tgt),
        "out_b": jnp.zeros((vocab_tgt,), jnp.float32),
    }
    return enc, dec


# --------------------------------------------------------------------------
# Main
# --------------------------------------------------------------------------

if __name__ == "__main__":
    B, S_SRC, S_TGT = 2, 8, 8
    D_MODEL, D_FF, N_HEADS = 32, 64, 4
    V_SRC, V_TGT = 48, 64

    root = jax.random.PRNGKey(0)
    pkey, dkey = jax.random.split(root)
    enc_p, dec_p = init_params(pkey, V_SRC, V_TGT, D_MODEL, D_FF, N_HEADS)

    k1, k2 = jax.random.split(dkey)
    src_tokens = jax.random.randint(k1, (B, S_SRC), 0, V_SRC, dtype=jnp.int32)
    src_lengths = jnp.array([S_SRC, 5], dtype=jnp.int32)
    prev_output_tokens = jax.random.randint(k2, (B, S_TGT), 0, V_TGT,
                                            dtype=jnp.int32)

    model = EncoderDecoderModel(enc_p, dec_p, N_HEADS)
    logits, extra = model.forward(src_tokens, src_lengths, prev_output_tokens)
    logits = jax.block_until_ready(logits)

    assert logits.shape == (B, S_TGT, V_TGT), logits.shape
    assert bool(jnp.all(jnp.isfinite(logits)))
    print("KERNEL_OK")
</pallas_src>

<mosaic_0001>
module attributes {stable_mosaic.version = 11 : i64} {
  func.func @_linear_kernel(%arg0: i32, %arg1: i32, %arg2: memref<16x32xbf16, #tpu.memory_space<vmem>>, %arg3: memref<32x96xbf16, #tpu.memory_space<vmem>>, %arg4: memref<1x96xf32, #tpu.memory_space<vmem>>, %arg5: memref<16x96xbf16, #tpu.memory_space<vmem>>) attributes {dimension_semantics = [#tpu.dimension_semantics<parallel>, #tpu.dimension_semantics<parallel>], iteration_bounds = array<i64: 1, 1>, scalar_prefetch = 0 : i64, scratch_operands = 0 : i64, tpu.core_type = #tpu.core_type<tc>, window_params = [{transform_indices = @transform_0, window_bounds = array<i64: 16, 32>}, {transform_indices = @transform_1, window_bounds = array<i64: 32, 96>}, {transform_indices = @transform_2, window_bounds = array<i64: 1, 96>}, {transform_indices = @transform_3, window_bounds = array<i64: 16, 96>}]} {
    %c0 = arith.constant 0 : index
    %c0_0 = arith.constant 0 : index
    %0 = vector.load %arg2[%c0, %c0_0] : memref<16x32xbf16, #tpu.memory_space<vmem>>, vector<16x32xbf16>
    %c0_1 = arith.constant 0 : index
    %c0_2 = arith.constant 0 : index
    %1 = vector.load %arg3[%c0_1, %c0_2] : memref<32x96xbf16, #tpu.memory_space<vmem>>, vector<32x96xbf16>
    %cst = arith.constant dense<0.000000e+00> : vector<16x96xf32>
    %2 = tpu.matmul %0, %1, %cst {dimension_numbers = #tpu.dot_dimension_numbers<[1], [0], [0], [1], [0, 0, 1, 1], [], []>} : vector<16x32xbf16>, vector<32x96xbf16>, vector<16x96xf32> -> vector<16x96xf32>
    %c0_3 = arith.constant 0 : index
    %c0_4 = arith.constant 0 : index
    %3 = vector.load %arg4[%c0_3, %c0_4] : memref<1x96xf32, #tpu.memory_space<vmem>>, vector<1x96xf32>
    %4 = vector.broadcast %3 : vector<1x96xf32> to vector<16x96xf32>
    %5 = arith.addf %2, %4 : vector<16x96xf32>
    %6 = arith.truncf %5 : vector<16x96xf32> to vector<16x96xbf16>
    %c0_5 = arith.constant 0 : index
    %c0_6 = arith.constant 0 : index
    %7 = vector.load %arg5[%c0_5, %c0_6] : memref<16x96xbf16, #tpu.memory_space<vmem>>, vector<16x96xbf16>
    tpu.vector_store %arg5[%c0_5, %c0_6], %6 {strides = array<i32>} : memref<16x96xbf16, #tpu.memory_space<vmem>>, vector<16x96xbf16>,
    return
  }
  func.func @transform_0(%arg0: i32, %arg1: i32) -> (i32, i32) {
    %c0_i32 = arith.constant 0 : i32
    %c0_i32_0 = arith.constant 0 : i32
    return %arg1, %c0_i32 : i32, i32
  }
  func.func @transform_1(%arg0: i32, %arg1: i32) -> (i32, i32) {
    %c0_i32 = arith.constant 0 : i32
    %c0_i32_0 = arith.constant 0 : i32
    return %c0_i32, %arg0 : i32, i32
  }
  func.func @transform_2(%arg0: i32, %arg1: i32) -> (i32, i32) {
    %c0_i32 = arith.constant 0 : i32
    %c0_i32_0 = arith.constant 0 : i32
    return %c0_i32, %arg0 : i32, i32
  }
  func.func @transform_3(%arg0: i32, %arg1: i32) -> (i32, i32) {
    %c0_i32 = arith.constant 0 : i32
    return %arg1, %arg0 : i32, i32
  }
}

</mosaic_0001>

<bundles_post_ra>
// kernel: tpu_custom_call.1
= control target key start
LH: loop header
LB: loop body
LE: loop exit
PB: predicated region body
PF: predicated region fallthrough
CT: control target
= control target key end

     0   :  { %8 = vsyncpa [#allocation3], 0  ;;  %s264_s0 = inlined_call_operand.hbm [shape: bf16[16,32], index: 0, kind: input, shape index: {}]   ;;  %s265_s1 = inlined_call_operand.hbm [shape: bf16[32,96], index: 1, kind: input, shape index: {}]   ;;  %s266_s2 = inlined_call_operand.vmem [shape: f32[1,96], index: 2, kind: input, shape index: {}]   ;;  %s267_s3 = inlined_call_operand.hbm [shape: bf16[16,96], index: 3, kind: output, shape index: {}]  }
   0x1   :  { %9 = vsyncpa [#allocation6], 0 }
   0x2   :  { %10 = vsyncpa [#allocation4], 0  ;;  %s15_s14 = sshll.u32 %s264_s0, 4  ;;  %s218_s15 = smov [#allocation2]   ;;  %s16_s14 = int_to_ptr.hbm [resolvable:$true] %s15_s14 }
   0x3   :  { %s17_s16 = sshll.u32 %s218_s15, 4  ;;  %s28_s19 = sshll.u32 %s265_s1, 4  ;;  %s18_s16 = int_to_ptr.vmem [resolvable:$true] %s17_s16  ;;  %s29_s19 = int_to_ptr.hbm [resolvable:$true] %s28_s19 }
   0x4   :  { %s219_s20 = smov 64   ;;  %s220_s21 = smov 4  }
   0x5   :  { %23 = dma.hbm_to_vmem [thread:$0]  %s16_s14, 128, %s18_s16, [#allocation3], %s219_s20, %s219_s20, %s220_s21  }
   0x6   :  { %s221_s22 = smov [#allocation5]  }
   0x7   :  { %s30_s23 = sshll.u32 %s221_s22, 4  ;;  %s31_s23 = int_to_ptr.vmem [resolvable:$true] %s30_s23 }
   0x8   :  { %36 = dma.hbm_to_vmem [thread:$0]  %s29_s19, 256, %s31_s23, [#allocation6], %s219_s20, %s219_s20, %s220_s21  }
   0x9   :  { %212 = dma.done.wait [#allocation3], 128  }
   0xa   :  { %213 = vsyncadd [#allocation3], 4294967168 }
   0xb   :  { %214 = dma.done.wait [#allocation6], 256  }
   0xc   :  { %215 = vsyncadd [#allocation6], 4294967040  ;;  %v133_v0 = vld [vmem:[#allocation5 + $0x8] sm:$0xff]  ;;  %v132_v1 = vld [vmem:[#allocation5] sm:$0xff]  ;;  %vm75_vm0 = vcmask 261120   ;;  %vm95_vm1 = vcmask 781312  }
   0xd   :  { %85 = vmatpush.bf16.msra.mxu0 %v133_v0  ;;  %v131_v2 = vld [vmem:[#allocation2] sm:$0xff]  ;;  %s222_s24 = smov [#allocation7]   ;;  %s104_s28 = sshll.u32 %s267_s3, 4  ;;  %s105_s28 = int_to_ptr.hbm [resolvable:$true] %s104_s28 }
   0xe   :  { %v139_v3 = vld [vmem:[%s266_s2] ss:$0 sm:$0xff]  ;;  %s102_s25 = sshll.u32 %s222_s24, 4  ;;  %s103_s25 = int_to_ptr.vmem [resolvable:$true] %s102_s25 }
  0x11   :  { %86 = vmatpush.bf16.msra.mxu0 %v132_v1 }
  0x14   :  { %130 = vmatmul.msk.bf16.vlgmr.msra.gmra.mxu0 %vm75_vm0, %v131_v2 }
  0x91   :  { %v88_v4 = vpop.f32.mrf.mxu0 }
  0x92   :  { %v89_v5 = vadd.f32 %v139_v3, %v88_v4 }
  0x94   :  { %v93_v6 = vpack.c.bf16 %v89_v5, %v89_v5 }
  0x96   :  { %96 = vst.msk [vmem:[#allocation7] sm:$0xf] %vm95_vm1, %v93_v6 }
  0x99   :  { %v90_v7 = vpop.f32.mrf.mxu0 }
  0x9a   :  { %v91_v8 = vadd.f32 %v139_v3, %v90_v7 }
  0x9c   :  { %v94_v9 = vpack.c.bf16 %v91_v8, %v91_v8 }
  0x9e   :  { %97 = vst.msk [vmem:[#allocation7 + $0x4] sm:$0xf] %vm95_vm1, %v94_v9 }
  0x9f   :  { %110 = dma.vmem_to_hbm [thread:$0]  %s103_s25, 128, %s105_s28, [#allocation4], %s219_s20, %s219_s20, %s220_s21  }
  0xa0   :  { %216 = dma.done.wait [#allocation4], 128  }
  0xa1   :  { %217 = vsyncadd [#allocation4], 4294967168 }
  0xa2   :  { %115 = vsyncpa [#allocation3], 1 }
  0xa3   :  { %116 = vsyncpa [#allocation6], 1 }
  0xa4   :  { %117 = vsyncpa [#allocation4], 1 }

</bundles_post_ra>
